<compile_context>
chip_gen: v7x
topology: tpu7x:2x2x1
jax: 0.10.0
libtpu: 0.0.40
codegen_flags: <defaults>
</compile_context>

<pallas_src>
import jax
import jax.numpy as jnp
import numpy as np
from jax.experimental import pallas as pl
from jax.experimental.pallas import tpu as pltpu

DROP_PROB = 0.6            # unused (eval mode)
HID_DIM = 16
INP_DIM = 64
N_HEADS = 4
LN_EPS = 1e-5
_NEG_BIG = -1e30           # finite "masked" score (avoids inf-inf NaN paths)

E = INP_DIM                # 64
D_HEAD = HID_DIM           # 16
HD = N_HEADS * HID_DIM     # 64  (== E, required by the residual)
FF = 4 * HD                # 256

# Packed-parameter blob layout (rows, all FF=256 lanes wide, bf16):
ROW_W1 = 0                 # w1   : (HD, FF)            rows [0, 64)
ROW_W2T = ROW_W1 + HD      # w2^T : (HD, FF)            rows [64, 128)
ROW_WQKV = ROW_W2T + HD    # [wq|wk|wv|0] : (E, FF)     rows [128, 192)
ROW_VEC = ROW_WQKV + E     # g1,b1,g2,b2,bb2,bb1,pad,pad rows [192, 200)
BLOB_ROWS = ROW_VEC + 8    # 200 (multiple of 8)


def _layernorm_onepass(x, gamma, beta):
    """One-pass LN: independent sum / sum-of-squares reduces (overlap in XLU)."""
    inv_n = 1.0 / x.shape[-1]
    s1 = jnp.sum(x, axis=-1, keepdims=True)
    s2 = jnp.sum(x * x, axis=-1, keepdims=True)
    mu = s1 * inv_n
    var = s2 * inv_n - mu * mu
    return (x - mu) * jax.lax.rsqrt(var + LN_EPS) * gamma + beta


def transformer_block_kernel(x_ref, wb_ref, bias_ref, o_ref):
    f32 = jnp.float32
    x = x_ref[...]                     # (N, E) f32, N = B*T
    n = x.shape[0]

    # ---- unpack weights (bf16 storage -> f32 compute) ----
    w1 = wb_ref[ROW_W1:ROW_W1 + HD, :].astype(f32)          # (HD, FF)
    w2t = wb_ref[ROW_W2T:ROW_W2T + HD, :].astype(f32)       # (HD, FF) = w2^T
    wqkv = wb_ref[ROW_WQKV:ROW_WQKV + E, :].astype(f32)     # (E, FF); cols 192:256 zero
    vecs = wb_ref[ROW_VEC:ROW_VEC + 8, :].astype(f32)       # (8, FF)
    g1 = vecs[0:1, :E]
    b1 = vecs[1:2, :E]
    g2 = vecs[2:3, :E]
    b2 = vecs[3:4, :E]
    bb2 = vecs[4:5, :E]
    bb1 = vecs[5:6, :]                                       # (1, FF)

    # ---- LayerNorm 1 ----
    h = _layernorm_onepass(x, g1, b1)

    # ---- fused QKV projection (one matmul) ----
    qkv = jnp.dot(h, wqkv, preferred_element_type=f32)       # (N, FF); last 64 lanes unused
    q = qkv[:, 0:HD] * f32(D_HEAD ** -0.5)                   # fold 1/sqrt(d) once
    k = qkv[:, HD:2 * HD]
    v = qkv[:, 2 * HD:3 * HD]

    # stack heads on the sublane axis: (N, H*d) -> (H*N, d)
    d = D_HEAD
    q_st = jnp.concatenate([q[:, i * d:(i + 1) * d] for i in range(N_HEADS)], axis=0)
    k_st = jnp.concatenate([k[:, i * d:(i + 1) * d] for i in range(N_HEADS)], axis=0)
    v_st = jnp.concatenate([v[:, i * d:(i + 1) * d] for i in range(N_HEADS)], axis=0)

    # ---- block-diagonal attention: ONE score matmul + ONE PV matmul ----
    dn = (((1,), (1,)), ((), ()))                             # contract feature axes: Q . K^T
    s = jax.lax.dot_general(q_st, k_st, dn, preferred_element_type=f32)  # (H*N, H*N)
    s = s + bias_ref[...]                                     # precomputed head/seq/causal bias
    m = jnp.max(s, axis=-1, keepdims=True)
    p = jnp.exp(s - m)
    l = jnp.sum(p, axis=-1, keepdims=True)
    pv = jnp.dot(p, v_st, preferred_element_type=f32)         # (H*N, d)
    o_st = pv * pl.reciprocal(l, approx=True)                 # EUP reciprocal

    # un-stack heads back onto lanes: (H*N, d) -> (N, H*d); stays in vregs
    attn = jnp.concatenate([o_st[i * n:(i + 1) * n, :] for i in range(N_HEADS)], axis=1)

    # ---- residual + LayerNorm 2 ----
    y = x + attn
    yn = _layernorm_onepass(y, g2, b2)

    # ---- MLP: Linear(HD -> 4HD), exact GELU, Linear(4HD -> HD) ----
    ff = jnp.dot(yn, w1, preferred_element_type=f32) + bb1
    ff = 0.5 * ff * (1.0 + jax.lax.erf(ff * f32(0.7071067811865475)))
    ff2 = jax.lax.dot_general(ff, w2t, dn, preferred_element_type=f32) + bb2

    # ---- final residual (LN2 output + MLP output, per the source) ----
    o_ref[...] = yn + ff2


def pack_params(p):
    """Pack all 11 parameter arrays into one (BLOB_ROWS, FF) bf16 buffer."""
    f32 = jnp.float32

    def padrow(v):
        v = jnp.asarray(v, f32)
        return jnp.pad(v, ((0, 0), (0, FF - v.shape[1])))

    w1 = jnp.asarray(p["w1"], f32)                             # (HD, FF)
    w2t = jnp.asarray(p["w2"], f32).T                          # (HD, FF)
    wqkv = jnp.concatenate(
        [jnp.asarray(p["wq"], f32), jnp.asarray(p["wk"], f32),
         jnp.asarray(p["wv"], f32), jnp.zeros((E, FF - 3 * HD), f32)], axis=1)
    vecs = jnp.concatenate(
        [padrow(p["g1"]), padrow(p["b1"]), padrow(p["g2"]), padrow(p["b2"]),
         padrow(p["bb2"]), jnp.asarray(p["bb1"], f32),
         jnp.zeros((2, FF), f32)], axis=0)                     # (8, FF)
    blob = jnp.concatenate([w1, w2t, wqkv, vecs], axis=0)      # (BLOB_ROWS, FF)
    assert blob.shape == (BLOB_ROWS, FF)
    return blob.astype(jnp.bfloat16)


def build_attn_bias(batch, seq, heads):
    """Additive bias (0 / -1e30) over stacked rows: same-head & same-seq & causal."""
    n = batch * seq
    hn = heads * n
    idx = np.arange(hn)
    r, c = idx[:, None], idx[None, :]
    same_head = (r // n) == (c // n)
    rr, cc = r % n, c % n
    same_seq = (rr // seq) == (cc // seq)
    causal = rr >= cc
    ok = same_head & same_seq & causal
    return jnp.asarray(np.where(ok, 0.0, _NEG_BIG), jnp.float32)


@jax.jit
def transformer_block(x, wblob, bias):
    B, T, E_ = x.shape
    rows = B * T
    assert wblob.shape == (BLOB_ROWS, FF)
    assert bias.shape == (N_HEADS * rows, N_HEADS * rows)
    x2 = x.reshape(rows, E_)            # free row-major reshape in the wrapper

    out2 = pl.pallas_call(
        transformer_block_kernel,
        out_shape=jax.ShapeDtypeStruct((rows, E_), jnp.float32),
        grid_spec=pltpu.PrefetchScalarGridSpec(
            num_scalar_prefetch=0,
            grid=(1,),                  # single step: weights DMA'd exactly once
            in_specs=[
                pl.BlockSpec((rows, E_), lambda i: (0, 0)),
                pl.BlockSpec((BLOB_ROWS, FF), lambda i: (0, 0)),
                pl.BlockSpec(bias.shape, lambda i: (0, 0)),
            ],
            out_specs=pl.BlockSpec((rows, E_), lambda i: (0, 0)),
        ),
        compiler_params=pltpu.CompilerParams(
            dimension_semantics=("arbitrary",)),
    )(x2, wblob, bias)
    return out2.reshape(B, T, E_)


def make_params(key):
    H, d = N_HEADS, HID_DIM
    ks = jax.random.split(key, 8)
    std = 0.02
    return {
        "g1": jnp.ones((1, E), jnp.float32),
        "b1": jnp.zeros((1, E), jnp.float32),
        "wq": jax.random.normal(ks[0], (E, H * d), jnp.float32) * std,
        "wk": jax.random.normal(ks[1], (E, H * d), jnp.float32) * std,
        "wv": jax.random.normal(ks[2], (E, H * d), jnp.float32) * std,
        "g2": jnp.ones((1, HD), jnp.float32),
        "b2": jnp.zeros((1, HD), jnp.float32),
        "w1": jax.random.normal(ks[3], (HD, FF), jnp.float32) * std,
        "bb1": jax.random.normal(ks[4], (1, FF), jnp.float32) * std,
        "w2": jax.random.normal(ks[5], (FF, HD), jnp.float32) * std,
        "bb2": jax.random.normal(ks[6], (1, HD), jnp.float32) * std,
    }


def reference(x, p):
    """Pure-JAX reference of the same forward pass (for verification)."""
    def ln(v, g, b):
        mu = jnp.mean(v, axis=-1, keepdims=True)
        var = jnp.mean((v - mu) ** 2, axis=-1, keepdims=True)
        return (v - mu) * jax.lax.rsqrt(var + LN_EPS) * g + b

    h = ln(x, p["g1"][0], p["b1"][0])
    q = h @ p["wq"]
    k = h @ p["wk"]
    v = h @ p["wv"]
    T = x.shape[1]
    causal = jnp.tril(jnp.ones((T, T), bool))
    d = HID_DIM
    outs = []
    for i in range(N_HEADS):
        qi, ki, vi = (a[..., i * d:(i + 1) * d] for a in (q, k, v))
        s = jnp.einsum("btd,bsd->bts", qi, ki) * d ** (-0.5)
        s = jnp.where(causal, s, -jnp.inf)
        pr = jax.nn.softmax(s, axis=-1)
        outs.append(jnp.einsum("bts,bsd->btd", pr, vi))
    attn = jnp.concatenate(outs, axis=-1)
    y = x + attn
    yn = ln(y, p["g2"][0], p["b2"][0])
    ff = jax.nn.gelu(yn @ p["w1"] + p["bb1"][0], approximate=False)
    ff2 = ff @ p["w2"] + p["bb2"][0]
    return yn + ff2


if __name__ == "__main__":
    key = jax.random.PRNGKey(0)
    kx, kp = jax.random.split(key)

    B, T = 2, 8
    x = jax.random.normal(kx, (B, T, INP_DIM), jnp.float32)
    params = make_params(kp)

    # Round weights to bf16 once so kernel (bf16 storage, f32 compute) and
    # reference share the exact same parameter values.
    params_q = {kk: vv.astype(jnp.bfloat16).astype(jnp.float32)
                for kk, vv in params.items()}

    wblob = pack_params(params_q)                   # one (200, 256) bf16 buffer
    bias = build_attn_bias(B, T, N_HEADS)           # (64, 64) additive mask

    out = transformer_block(x, wblob, bias)
    out = jax.block_until_ready(out)

    ref = reference(x, params_q)
    np.testing.assert_allclose(np.asarray(out), np.asarray(ref),
                               rtol=1e-3, atol=1e-3)
    print("KERNEL_OK")
</pallas_src>

<mosaic_0001>
module attributes {stable_mosaic.version = 11 : i64} {
  func.func @transformer_block_kernel(%arg0: i32, %arg1: memref<16x64xf32, #tpu.memory_space<vmem>>, %arg2: memref<200x256xbf16, #tpu.memory_space<vmem>>, %arg3: memref<64x64xf32, #tpu.memory_space<vmem>>, %arg4: memref<16x64xf32, #tpu.memory_space<vmem>>) attributes {dimension_semantics = [#tpu.dimension_semantics<arbitrary>], iteration_bounds = array<i64: 1>, scalar_prefetch = 0 : i64, scratch_operands = 0 : i64, tpu.core_type = #tpu.core_type<tc>, window_params = [{pipeline_mode = #tpu.pipeline_mode<synchronous>, transform_indices = @transform_0, window_bounds = array<i64: 16, 64>}, {pipeline_mode = #tpu.pipeline_mode<synchronous>, transform_indices = @transform_1, window_bounds = array<i64: 200, 256>}, {pipeline_mode = #tpu.pipeline_mode<synchronous>, transform_indices = @transform_2, window_bounds = array<i64: 64, 64>}, {pipeline_mode = #tpu.pipeline_mode<synchronous>, transform_indices = @transform_3, window_bounds = array<i64: 16, 64>}]} {
    %c0 = arith.constant 0 : index
    %c0_0 = arith.constant 0 : index
    %0 = vector.load %arg1[%c0, %c0_0] : memref<16x64xf32, #tpu.memory_space<vmem>>, vector<16x64xf32>
    %c0_1 = arith.constant 0 : index
    %c0_2 = arith.constant 0 : index
    %1 = vector.load %arg2[%c0_1, %c0_2] : memref<200x256xbf16, #tpu.memory_space<vmem>>, vector<64x256xbf16>
    %2 = arith.extf %1 : vector<64x256xbf16> to vector<64x256xf32>
    %c64 = arith.constant 64 : index
    %c0_3 = arith.constant 0 : index
    %3 = vector.load %arg2[%c64, %c0_3] : memref<200x256xbf16, #tpu.memory_space<vmem>>, vector<64x256xbf16>
    %4 = arith.extf %3 : vector<64x256xbf16> to vector<64x256xf32>
    %c128 = arith.constant 128 : index
    %c0_4 = arith.constant 0 : index
    %5 = vector.load %arg2[%c128, %c0_4] : memref<200x256xbf16, #tpu.memory_space<vmem>>, vector<64x256xbf16>
    %6 = arith.extf %5 : vector<64x256xbf16> to vector<64x256xf32>
    %c192 = arith.constant 192 : index
    %c0_5 = arith.constant 0 : index
    %7 = vector.load %arg2[%c192, %c0_5] : memref<200x256xbf16, #tpu.memory_space<vmem>>, vector<8x256xbf16>
    %8 = arith.extf %7 : vector<8x256xbf16> to vector<8x256xf32>
    %9 = vector.extract_strided_slice %8 {offsets = [0, 0], sizes = [1, 64], strides = [1, 1]} : vector<8x256xf32> to vector<1x64xf32>
    %10 = vector.extract_strided_slice %8 {offsets = [1, 0], sizes = [1, 64], strides = [1, 1]} : vector<8x256xf32> to vector<1x64xf32>
    %11 = vector.extract_strided_slice %8 {offsets = [2, 0], sizes = [1, 64], strides = [1, 1]} : vector<8x256xf32> to vector<1x64xf32>
    %12 = vector.extract_strided_slice %8 {offsets = [3, 0], sizes = [1, 64], strides = [1, 1]} : vector<8x256xf32> to vector<1x64xf32>
    %13 = vector.extract_strided_slice %8 {offsets = [4, 0], sizes = [1, 64], strides = [1, 1]} : vector<8x256xf32> to vector<1x64xf32>
    %14 = vector.extract_strided_slice %8 {offsets = [5, 0], sizes = [1, 256], strides = [1, 1]} : vector<8x256xf32> to vector<1x256xf32>
    %cst = arith.constant dense<0.000000e+00> : vector<16xf32>
    %15 = vector.multi_reduction <add>, %0, %cst [1] : vector<16x64xf32> to vector<16xf32>
    %16 = vector.shape_cast %15 : vector<16xf32> to vector<16x1xf32>
    %17 = arith.mulf %0, %0 : vector<16x64xf32>
    %cst_6 = arith.constant dense<0.000000e+00> : vector<16xf32>
    %18 = vector.multi_reduction <add>, %17, %cst_6 [1] : vector<16x64xf32> to vector<16xf32>
    %19 = vector.shape_cast %18 : vector<16xf32> to vector<16x1xf32>
    %cst_7 = arith.constant 1.562500e-02 : f32
    %20 = vector.broadcast %cst_7 : f32 to vector<16x1xf32>
    %21 = arith.mulf %16, %20 : vector<16x1xf32>
    %cst_8 = arith.constant 1.562500e-02 : f32
    %22 = vector.broadcast %cst_8 : f32 to vector<16x1xf32>
    %23 = arith.mulf %19, %22 : vector<16x1xf32>
    %24 = arith.mulf %21, %21 : vector<16x1xf32>
    %25 = arith.subf %23, %24 : vector<16x1xf32>
    %26 = vector.broadcast %21 : vector<16x1xf32> to vector<16x64xf32>
    %27 = arith.subf %0, %26 : vector<16x64xf32>
    %cst_9 = arith.constant 9.99999974E-6 : f32
    %28 = vector.broadcast %cst_9 : f32 to vector<16x1xf32>
    %29 = arith.addf %25, %28 : vector<16x1xf32>
    %30 = math.rsqrt %29 : vector<16x1xf32>
    %31 = vector.broadcast %30 : vector<16x1xf32> to vector<16x64xf32>
    %32 = arith.mulf %27, %31 : vector<16x64xf32>
    %33 = vector.broadcast %9 : vector<1x64xf32> to vector<16x64xf32>
    %34 = arith.mulf %32, %33 : vector<16x64xf32>
    %35 = vector.broadcast %10 : vector<1x64xf32> to vector<16x64xf32>
    %36 = arith.addf %34, %35 : vector<16x64xf32>
    %cst_10 = arith.constant dense<0.000000e+00> : vector<16x256xf32>
    %37 = tpu.matmul %36, %6, %cst_10 {dimension_numbers = #tpu.dot_dimension_numbers<[1], [0], [0], [1], [0, 0, 1, 1], [], []>} : vector<16x64xf32>, vector<64x256xf32>, vector<16x256xf32> -> vector<16x256xf32>
    %38 = vector.extract_strided_slice %37 {offsets = [0, 0], sizes = [16, 64], strides = [1, 1]} : vector<16x256xf32> to vector<16x64xf32>
    %cst_11 = arith.constant 2.500000e-01 : f32
    %39 = vector.broadcast %cst_11 : f32 to vector<16x64xf32>
    %40 = arith.mulf %38, %39 : vector<16x64xf32>
    %41 = vector.extract_strided_slice %37 {offsets = [0, 64], sizes = [16, 64], strides = [1, 1]} : vector<16x256xf32> to vector<16x64xf32>
    %42 = vector.extract_strided_slice %37 {offsets = [0, 128], sizes = [16, 64], strides = [1, 1]} : vector<16x256xf32> to vector<16x64xf32>
    %43 = vector.extract_strided_slice %40 {offsets = [0, 0], sizes = [16, 16], strides = [1, 1]} : vector<16x64xf32> to vector<16x16xf32>
    %44 = vector.extract_strided_slice %40 {offsets = [0, 16], sizes = [16, 16], strides = [1, 1]} : vector<16x64xf32> to vector<16x16xf32>
    %45 = vector.extract_strided_slice %40 {offsets = [0, 32], sizes = [16, 16], strides = [1, 1]} : vector<16x64xf32> to vector<16x16xf32>
    %46 = vector.extract_strided_slice %40 {offsets = [0, 48], sizes = [16, 16], strides = [1, 1]} : vector<16x64xf32> to vector<16x16xf32>
    %47 = tpu.concatenate %43, %44, %45, %46 in 0 : vector<16x16xf32>, vector<16x16xf32>, vector<16x16xf32>, vector<16x16xf32> -> vector<64x16xf32>
    %48 = vector.extract_strided_slice %41 {offsets = [0, 0], sizes = [16, 16], strides = [1, 1]} : vector<16x64xf32> to vector<16x16xf32>
    %49 = vector.extract_strided_slice %41 {offsets = [0, 16], sizes = [16, 16], strides = [1, 1]} : vector<16x64xf32> to vector<16x16xf32>
    %50 = vector.extract_strided_slice %41 {offsets = [0, 32], sizes = [16, 16], strides = [1, 1]} : vector<16x64xf32> to vector<16x16xf32>
    %51 = vector.extract_strided_slice %41 {offsets = [0, 48], sizes = [16, 16], strides = [1, 1]} : vector<16x64xf32> to vector<16x16xf32>
    %52 = tpu.concatenate %48, %49, %50, %51 in 0 : vector<16x16xf32>, vector<16x16xf32>, vector<16x16xf32>, vector<16x16xf32> -> vector<64x16xf32>
    %53 = vector.extract_strided_slice %42 {offsets = [0, 0], sizes = [16, 16], strides = [1, 1]} : vector<16x64xf32> to vector<16x16xf32>
    %54 = vector.extract_strided_slice %42 {offsets = [0, 16], sizes = [16, 16], strides = [1, 1]} : vector<16x64xf32> to vector<16x16xf32>
    %55 = vector.extract_strided_slice %42 {offsets = [0, 32], sizes = [16, 16], strides = [1, 1]} : vector<16x64xf32> to vector<16x16xf32>
    %56 = vector.extract_strided_slice %42 {offsets = [0, 48], sizes = [16, 16], strides = [1, 1]} : vector<16x64xf32> to vector<16x16xf32>
    %57 = tpu.concatenate %53, %54, %55, %56 in 0 : vector<16x16xf32>, vector<16x16xf32>, vector<16x16xf32>, vector<16x16xf32> -> vector<64x16xf32>
    %cst_12 = arith.constant dense<0.000000e+00> : vector<64x64xf32>
    %58 = tpu.matmul %47, %52, %cst_12 {dimension_numbers = #tpu.dot_dimension_numbers<[1], [1], [0], [0], [0, 0, 1, 0], [], []>} : vector<64x16xf32>, vector<64x16xf32>, vector<64x64xf32> -> vector<64x64xf32>
    %c0_13 = arith.constant 0 : index
    %c0_14 = arith.constant 0 : index
    %59 = vector.load %arg3[%c0_13, %c0_14] : memref<64x64xf32, #tpu.memory_space<vmem>>, vector<64x64xf32>
    %60 = arith.addf %58, %59 : vector<64x64xf32>
    %cst_15 = arith.constant dense<0xFF800000> : vector<64xf32>
    %61 = vector.multi_reduction <maximumf>, %60, %cst_15 [1] : vector<64x64xf32> to vector<64xf32>
    %62 = vector.shape_cast %61 : vector<64xf32> to vector<64x1xf32>
    %63 = vector.broadcast %62 : vector<64x1xf32> to vector<64x64xf32>
    %64 = arith.subf %60, %63 : vector<64x64xf32>
    %65 = math.exp %64 : vector<64x64xf32>
    %cst_16 = arith.constant dense<0.000000e+00> : vector<64xf32>
    %66 = vector.multi_reduction <add>, %65, %cst_16 [1] : vector<64x64xf32> to vector<64xf32>
    %67 = vector.shape_cast %66 : vector<64xf32> to vector<64x1xf32>
    %cst_17 = arith.constant dense<0.000000e+00> : vector<64x16xf32>
    %68 = tpu.matmul %65, %57, %cst_17 {dimension_numbers = #tpu.dot_dimension_numbers<[1], [0], [0], [1], [0, 0, 1, 1], [], []>} : vector<64x64xf32>, vector<64x16xf32>, vector<64x16xf32> -> vector<64x16xf32>
    %69 = tpu.reciprocal %67 {approx = true} : vector<64x1xf32> -> vector<64x1xf32>
    %70 = vector.broadcast %69 : vector<64x1xf32> to vector<64x16xf32>
    %71 = arith.mulf %68, %70 : vector<64x16xf32>
    %72 = vector.extract_strided_slice %71 {offsets = [0, 0], sizes = [16, 16], strides = [1, 1]} : vector<64x16xf32> to vector<16x16xf32>
    %73 = vector.extract_strided_slice %71 {offsets = [16, 0], sizes = [16, 16], strides = [1, 1]} : vector<64x16xf32> to vector<16x16xf32>
    %74 = vector.extract_strided_slice %71 {offsets = [32, 0], sizes = [16, 16], strides = [1, 1]} : vector<64x16xf32> to vector<16x16xf32>
    %75 = vector.extract_strided_slice %71 {offsets = [48, 0], sizes = [16, 16], strides = [1, 1]} : vector<64x16xf32> to vector<16x16xf32>
    %76 = tpu.concatenate %72, %73, %74, %75 in 1 : vector<16x16xf32>, vector<16x16xf32>, vector<16x16xf32>, vector<16x16xf32> -> vector<16x64xf32>
    %77 = arith.addf %0, %76 : vector<16x64xf32>
    %cst_18 = arith.constant dense<0.000000e+00> : vector<16xf32>
    %78 = vector.multi_reduction <add>, %77, %cst_18 [1] : vector<16x64xf32> to vector<16xf32>
    %79 = vector.shape_cast %78 : vector<16xf32> to vector<16x1xf32>
    %80 = arith.mulf %77, %77 : vector<16x64xf32>
    %cst_19 = arith.constant dense<0.000000e+00> : vector<16xf32>
    %81 = vector.multi_reduction <add>, %80, %cst_19 [1] : vector<16x64xf32> to vector<16xf32>
    %82 = vector.shape_cast %81 : vector<16xf32> to vector<16x1xf32>
    %cst_20 = arith.constant 1.562500e-02 : f32
    %83 = vector.broadcast %cst_20 : f32 to vector<16x1xf32>
    %84 = arith.mulf %79, %83 : vector<16x1xf32>
    %cst_21 = arith.constant 1.562500e-02 : f32
    %85 = vector.broadcast %cst_21 : f32 to vector<16x1xf32>
    %86 = arith.mulf %82, %85 : vector<16x1xf32>
    %87 = arith.mulf %84, %84 : vector<16x1xf32>
    %88 = arith.subf %86, %87 : vector<16x1xf32>
    %89 = vector.broadcast %84 : vector<16x1xf32> to vector<16x64xf32>
    %90 = arith.subf %77, %89 : vector<16x64xf32>
    %cst_22 = arith.constant 9.99999974E-6 : f32
    %91 = vector.broadcast %cst_22 : f32 to vector<16x1xf32>
    %92 = arith.addf %88, %91 : vector<16x1xf32>
    %93 = math.rsqrt %92 : vector<16x1xf32>
    %94 = vector.broadcast %93 : vector<16x1xf32> to vector<16x64xf32>
    %95 = arith.mulf %90, %94 : vector<16x64xf32>
    %96 = vector.broadcast %11 : vector<1x64xf32> to vector<16x64xf32>
    %97 = arith.mulf %95, %96 : vector<16x64xf32>
    %98 = vector.broadcast %12 : vector<1x64xf32> to vector<16x64xf32>
    %99 = arith.addf %97, %98 : vector<16x64xf32>
    %cst_23 = arith.constant dense<0.000000e+00> : vector<16x256xf32>
    %100 = tpu.matmul %99, %2, %cst_23 {dimension_numbers = #tpu.dot_dimension_numbers<[1], [0], [0], [1], [0, 0, 1, 1], [], []>} : vector<16x64xf32>, vector<64x256xf32>, vector<16x256xf32> -> vector<16x256xf32>
    %101 = vector.broadcast %14 : vector<1x256xf32> to vector<16x256xf32>
    %102 = arith.addf %100, %101 : vector<16x256xf32>
    %cst_24 = arith.constant 5.000000e-01 : f32
    %103 = vector.broadcast %cst_24 : f32 to vector<16x256xf32>
    %104 = arith.mulf %103, %102 : vector<16x256xf32>
    %cst_25 = arith.constant 0.707106769 : f32
    %105 = vector.broadcast %cst_25 : f32 to vector<16x256xf32>
    %106 = arith.mulf %102, %105 : vector<16x256xf32>
    %107 = math.erf %106 : vector<16x256xf32>
    %cst_26 = arith.constant 1.000000e+00 : f32
    %108 = vector.broadcast %cst_26 : f32 to vector<16x256xf32>
    %109 = arith.addf %108, %107 : vector<16x256xf32>
    %110 = arith.mulf %104, %109 : vector<16x256xf32>
    %cst_27 = arith.constant dense<0.000000e+00> : vector<16x64xf32>
    %111 = tpu.matmul %110, %4, %cst_27 {dimension_numbers = #tpu.dot_dimension_numbers<[1], [1], [0], [0], [0, 0, 1, 0], [], []>} : vector<16x256xf32>, vector<64x256xf32>, vector<16x64xf32> -> vector<16x64xf32>
    %112 = vector.broadcast %13 : vector<1x64xf32> to vector<16x64xf32>
    %113 = arith.addf %111, %112 : vector<16x64xf32>
    %114 = arith.addf %99, %113 : vector<16x64xf32>
    %c0_28 = arith.constant 0 : index
    %c0_29 = arith.constant 0 : index
    %115 = vector.load %arg4[%c0_28, %c0_29] : memref<16x64xf32, #tpu.memory_space<vmem>>, vector<16x64xf32>
    tpu.vector_store %arg4[%c0_28, %c0_29], %114 {strides = array<i32>} : memref<16x64xf32, #tpu.memory_space<vmem>>, vector<16x64xf32>,
    return
  }
  func.func @transform_0(%arg0: i32) -> (i32, i32) {
    %c0_i32 = arith.constant 0 : i32
    %c0_i32_0 = arith.constant 0 : i32
    %c0_i32_1 = arith.constant 0 : i32
    return %c0_i32, %c0_i32_0 : i32, i32
  }
  func.func @transform_1(%arg0: i32) -> (i32, i32) {
    %c0_i32 = arith.constant 0 : i32
    %c0_i32_0 = arith.constant 0 : i32
    %c0_i32_1 = arith.constant 0 : i32
    return %c0_i32, %c0_i32_0 : i32, i32
  }
  func.func @transform_2(%arg0: i32) -> (i32, i32) {
    %c0_i32 = arith.constant 0 : i32
    %c0_i32_0 = arith.constant 0 : i32
    %c0_i32_1 = arith.constant 0 : i32
    return %c0_i32, %c0_i32_0 : i32, i32
  }
  func.func @transform_3(%arg0: i32) -> (i32, i32) {
    %c0_i32 = arith.constant 0 : i32
    %c0_i32_0 = arith.constant 0 : i32
    %c0_i32_1 = arith.constant 0 : i32
    return %c0_i32, %c0_i32_0 : i32, i32
  }
}

</mosaic_0001>

<bundles_post_ra>
// kernel: transformer_block.1
= control target key start
LH: loop header
LB: loop body
LE: loop exit
PB: predicated region body
PF: predicated region fallthrough
CT: control target
= control target key end

     0   :  { %8 = vsyncpa [#allocation3], 0  ;;  %s1672_s0 = inlined_call_operand.hbm [shape: f32[16,64], index: 0, kind: input, shape index: {}]   ;;  %s1673_s1 = inlined_call_operand.hbm [shape: bf16[200,256], index: 1, kind: input, shape index: {}]   ;;  %s1674_s2 = inlined_call_operand.hbm [shape: f32[64,64], index: 2, kind: input, shape index: {}]   ;;  %s1675_s3 = inlined_call_operand.hbm [shape: f32[16,64], index: 3, kind: output, shape index: {}]  }
   0x1   :  { %9 = vsyncpa [#allocation6], 0 }
   0x2   :  { %10 = vsyncpa [#allocation4], 0  ;;  %s1446_s12 = smov [#allocation5]   ;;  %s1447_s14 = smov [#allocation2]  }
   0x3   :  { %s28_s13 = sshll.u32 %s1446_s12, 4  ;;  %s16_s15 = sshll.u32 %s1447_s14, 4  ;;  %s29_s13 = int_to_ptr.vmem [resolvable:$true] %s28_s13  ;;  %s1480_s15 = int_to_ptr.vmem [resolvable:$true] %s16_s15 }
   0x4   :  { %s1352_s18 = scalar_lea.hbm %s1673_s1, 3200 }
   0x5   :  { %p1353_p0 = scmp.ne.s32.totalorder %s1673_s1, %s1352_s18  ;;  %p1356_p1 = scmp.lt.u32.totalorder %s1352_s18, %s1673_s1 }
   0x7   :  { %p1358_p2 = pnand %p1356_p1, %p1353_p0 }
   0x9   :  { %1361 = shalt.err (!%p1358_p2)
}
   0xa   :  { %s1362_s23 = scalar_lea.vmem %s29_s13, 3200  ;;  %p1367_p4 = scmp.lt.s32.totalorder %s29_s13, %s29_s13 }
   0xb   :  { %p1363_p3 = scmp.ne.s32.totalorder %s29_s13, %s1362_s23  ;;  %p1368_p5 = scmp.lt.s32.totalorder %s1362_s23, %s1362_s23 }
   0xd   :  { %p1369_p6 = por %p1368_p5, %p1367_p4 }
   0xf   :  { %p1370_p7 = pnand %p1369_p6, %p1363_p3 }
  0x11   :  { %1373 = shalt.err (!%p1370_p7)
}
  0x12   :  { %s1448_s24 = smov 128   ;;  %s1449_s25 = smov 8  }
  0x13   :  { %34 = dma.hbm_to_vmem [thread:$0]  %s1673_s1, 3200, %s29_s13, [#allocation6], %s1448_s24, %s1448_s24, %s1449_s25  }
  0x14   :  { %s1374_s30 = scalar_lea.hbm %s1672_s0, 256 }
  0x15   :  { %p1375_p8 = scmp.ne.s32.totalorder %s1672_s0, %s1374_s30  ;;  %p1378_p9 = scmp.lt.u32.totalorder %s1374_s30, %s1672_s0 }
  0x17   :  { %p1380_p10 = pnand %p1378_p9, %p1375_p8 }
  0x19   :  { %1383 = shalt.err (!%p1380_p10)
}
  0x1a   :  { %s1384_s8 = scalar_lea.vmem %s1480_s15, 256  ;;  %p1389_p12 = scmp.lt.s32.totalorder %s1480_s15, %s1480_s15 }
  0x1b   :  { %p1385_p11 = scmp.ne.s32.totalorder %s1480_s15, %s1384_s8  ;;  %p1390_p13 = scmp.lt.s32.totalorder %s1384_s8, %s1384_s8 }
  0x1d   :  { %p1391_p0 = por %p1390_p13, %p1389_p12 }
  0x1f   :  { %p1392_p1 = pnand %p1391_p0, %p1385_p11 }
  0x21   :  { %1395 = shalt.err (!%p1392_p1)
}
  0x22   :  { %22 = dma.hbm_to_vmem [thread:$0]  %s1672_s0, 256, %s1480_s15, [#allocation3], %s1448_s24, %s1448_s24, %s1449_s25  }
  0x23   :  { %s1450_s10 = smov [#allocation7]   ;;  %s1396_s14 = scalar_lea.hbm %s1674_s2, 1024 }
  0x24   :  { %s40_s11 = sshll.u32 %s1450_s10, 4  ;;  %p1397_p2 = scmp.ne.s32.totalorder %s1674_s2, %s1396_s14  ;;  %s41_s11 = int_to_ptr.vmem [resolvable:$true] %s40_s11 }
  0x25   :  { %p1400_p3 = scmp.lt.u32.totalorder %s1396_s14, %s1674_s2 }
  0x27   :  { %p1402_p4 = pnand %p1400_p3, %p1397_p2 }
  0x29   :  { %1405 = shalt.err (!%p1402_p4)
}
  0x2a   :  { %s1406_s20 = scalar_lea.vmem %s41_s11, 1024  ;;  %p1411_p6 = scmp.lt.s32.totalorder %s41_s11, %s41_s11 }
  0x2b   :  { %p1407_p5 = scmp.ne.s32.totalorder %s41_s11, %s1406_s20  ;;  %p1412_p7 = scmp.lt.s32.totalorder %s1406_s20, %s1406_s20 }
  0x2d   :  { %p1413_p8 = por %p1412_p7, %p1411_p6 }
  0x2f   :  { %p1414_p9 = pnand %p1413_p8, %p1407_p5 }
  0x31   :  { %1417 = shalt.err (!%p1414_p9)
}
  0x32   :  { %46 = dma.hbm_to_vmem [thread:$0]  %s1674_s2, 1024, %s41_s11, [#allocation6], %s1448_s24, %s1448_s24, %s1449_s25  }
  0x33   :  { %1440 = dma.done.wait [#allocation3], 256  }
  0x34   :  { %1441 = vsyncadd [#allocation3], 4294967040 }
  0x35   :  { %1442 = dma.done.wait [#allocation6], 4224  }
  0x36   :  { %1443 = vsyncadd [#allocation6], 4294963072  ;;  %vm133_vm0 = vcmask 523264   ;;  %v1532_v0 = vld [vmem:[#allocation2 + $0x8] sm:$0xff]  ;;  %v1534_v1 = vld [vmem:[#allocation2] sm:$0xff]  ;;  %v1451_v13 = vmov 0.0   ;;  %v164_v31 = vlaneseq }
  0x37   :  { %v137_v2 = vsel %vm133_vm0, %v1532_v0, 0.0  ;;  %v134_v3 = vsel %vm133_vm0, %v1534_v1, 0.0  ;;  %v141_v4 = vmul.f32 %v1532_v0, %v1532_v0  ;;  %v140_v5 = vmul.f32 %v1534_v1, %v1534_v1  ;;  %v1268_v8 = vld [vmem:[#allocation5 + $0x84] ss:$8 sps:$4 sm:$0xff]   ;;  %v1270_v9 = vld [vmem:[#allocation5 + $0x80] ss:$8 sps:$4 sm:$0xff]   ;;  %246 = vmatprep.mubr.f32.mxu0 %v1451_v13 }
  0x38   :  { %138 = vadd.xlane.f32.xlu1 %v137_v2  ;;  %135 = vadd.xlane.f32.xlu0 %v134_v3  ;;  %v1271_v10 = vld [vmem:[#allocation5 + $0x94] ss:$8 sps:$4 sm:$0xff]   ;;  %v1273_v11 = vld [vmem:[#allocation5 + $0x90] ss:$8 sps:$4 sm:$0xff]   ;;  %v1274_v12 = vld [vmem:[#allocation5 + $0xa4] ss:$8 sps:$4 sm:$0xff]  }
  0x39   :  { %v145_v6 = vsel %vm133_vm0, %v141_v4, 0.0  ;;  %v142_v7 = vsel %vm133_vm0, %v140_v5, 0.0  ;;  %1093 = vmatprep.subr.bf16.mxu0 %v1268_v8  ;;  %v1276_v14 = vld [vmem:[#allocation5 + $0xa0] ss:$8 sps:$4 sm:$0xff]   ;;  %v1277_v15 = vld [vmem:[#allocation5 + $0xb4] ss:$8 sps:$4 sm:$0xff]  }
  0x3a   :  { %1095 = vmatpush1.bf16.msra.mxu0 %v1270_v9  ;;  %v1279_v16 = vld [vmem:[#allocation5 + $0xb0] ss:$8 sps:$4 sm:$0xff]   ;;  %v1547_v32 = vshrl.u32 %v164_v31, 7  ;;  %v1549_v33 = vld [vmem:[#allocation5 + $0xc0] sm:$0xff]  ;;  %vm333_vm1 = vcmask 130048   ;;  %s1452_s2 = smov 96  }
  0x3b   :  { %1097 = vmatprep.subr.bf16.mxu0 %v1271_v10  ;;  %v1552_v34 = vunpack.c.l.bf16 %v1549_v33  ;;  %s1453_s21 = smov 112   ;;  %s1454_s22 = smov 80   ;;  %vm1570_vm2 = vmpackc.low %vm333_vm1, %vm333_vm1  ;;  %vm714_vm3 = vcmask 261120   ;;  %vm717_vm4 = vcmask 392192  }
  0x3c   :  { %146 = vadd.xlane.f32.xlu1 %v145_v6  ;;  %143 = vadd.xlane.f32.xlu0 %v142_v7  ;;  %v166_v35 = vsub.s32 0, %v1547_v32  ;;  %v172_v36 = vsub.s32 1, %v1547_v32  ;;  %s1455_s23 = smov 64   ;;  %s1456_s26 = smov 16  }
  0x3d   :  { %s1457_s27 = smov 32   ;;  %s1458_s28 = smov 48  }
  0x3e   :  { %1099 = vmatpush1.bf16.msra.mxu0 %v1273_v11  ;;  %v167_v40 = vrot.slane %v1552_v34, %v166_v35  ;;  %v173_v43 = vrot.slane %v1552_v34, %v172_v36  ;;  %v312_v36 = vld [vmem:[#allocation7 + $0x18] sm:$0xff]  ;;  %s1459_s29 = smov [#allocation8]  }
  0x3f   :  { %1101 = vmatprep.subr.bf16.mxu0 %v1274_v12  ;;  %s963_s30 = sshll.u32 %s1459_s29, 4  ;;  %s964_s30 = int_to_ptr.vmem [resolvable:$true] %s963_s30 }
  0x40   :  { %s1418_s4 = scalar_lea.vmem %s964_s30, 256  ;;  %p1423_p11 = scmp.lt.s32.totalorder %s964_s30, %s964_s30 }
  0x41   :  { %p1419_p10 = scmp.ne.s32.totalorder %s964_s30, %s1418_s4  ;;  %p1424_p12 = scmp.lt.s32.totalorder %s1418_s4, %s1418_s4 }
  0x42   :  { %1103 = vmatpush1.bf16.msra.mxu0 %v1276_v14 }
  0x43   :  { %1105 = vmatprep.subr.bf16.mxu0 %v1277_v15  ;;  %p1425_p13 = por %p1424_p12, %p1423_p11 }
  0x45   :  { %p1426_p0 = pnand %p1425_p13, %p1419_p10 }
  0x46   :  { %1107 = vmatpush1.bf16.msra.mxu0 %v1279_v16 }
  0xc5   :  { %v139_v17 = vpop.xlane.xlu1 %138  ;;  %v136_v18 = vpop.xlane.xlu0 %135 }
  0xc6   :  { %v149_v19 = vmul.f32 0.015625, %v139_v17  ;;  %v148_v20 = vmul.f32 0.015625, %v136_v18 }
  0xc8   :  { %v153_v21 = vmul.f32 %v149_v19, %v149_v19  ;;  %v152_v24 = vmul.f32 %v148_v20, %v148_v20  ;;  %v157_v38 = vsub.f32 %v1532_v0, %v149_v19  ;;  %v156_v39 = vsub.f32 %v1534_v1, %v148_v20 }
  0xc9   :  { %v147_v22 = vpop.xlane.xlu1 %146  ;;  %v144_v23 = vpop.xlane.xlu0 %143 }
  0xca   :  { %v151_v25 = vmul.f32 0.015625, %v147_v22  ;;  %v150_v26 = vmul.f32 0.015625, %v144_v23 }
  0xcc   :  { %v155_v27 = vsub.f32 %v151_v25, %v153_v21  ;;  %v154_v28 = vsub.f32 %v150_v26, %v152_v24 }
  0xce   :  { %v159_v29 = vadd.f32 1e-05, %v155_v27  ;;  %v158_v30 = vadd.f32 1e-05, %v154_v28  ;;  %v310_v27 = vld [vmem:[#allocation7 + $0x8] sm:$0xff]  ;;  %v309_v28 = vld [vmem:[#allocation7] sm:$0xff] }
  0xd0   :  { %1304 = vrsqrt.f32 %v159_v29 }
  0xd1   :  { %1306 = vrsqrt.f32 %v158_v30 }
  0xda   :  { %v1305_v37 = vpop.eup %1304 }
  0xdb   :  { %v1307_v41 = vpop.eup %1306  ;;  %v163_v44 = vmul.f32 %v1305_v37, %v157_v38 }
  0xdc   :  { %v162_v42 = vmul.f32 %v1307_v41, %v156_v39  ;;  %v311_v39 = vld [vmem:[#allocation7 + $0x10] sm:$0xff] }
  0xdd   :  { %v169_v47 = vmul.f32 %v167_v40, %v163_v44 }
  0xde   :  { %v168_v45 = vmul.f32 %v167_v40, %v162_v42 }
  0xdf   :  { %v175_v48 = vadd.f32 %v173_v43, %v169_v47 }
  0xe0   :  { %v174_v46 = vadd.f32 %v173_v43, %v168_v45  ;;  %v313_v45 = vld [vmem:[#allocation7 + $0x20] sm:$0xff] }
  0xe2   :  { %976 = vmatmul.mubr.msk.f32.vlgmr.msra.gmra.mrb[0].mxu0 %vm133_vm0, %v174_v46  ;;  %v314_v46 = vld [vmem:[#allocation7 + $0x28] sm:$0xff] }
  0xe3   :  { %252 = vmatprep.mubr.f32.mxu0 %v1451_v13 }
  0xe6   :  { %977 = vmatmul.mubr.msk.f32.gmra.mrb[2].mxu0 %vm133_vm0, %v175_v48 }
 0x1b5   :  { %v248_v49 = vpop.f32.mrb[0].mxu0 }
 0x1b6   :  { %v250_v50 = vpop.f32.mrb[1].mxu0  ;;  %v259_v51 = vmul.f32 0.25, %v248_v49 }
 0x1b8   :  { %1052 = vmatprep.mubr.msk.f32.mxu1 %vm333_vm1, %v259_v51 }
 0x1b9   :  { %v254_v52 = vpop.f32.mrb[2].mxu0 }
 0x1ba   :  { %v256_v53 = vpop.f32.mrb[3].mxu0  ;;  %v1223_v54 = vpack.i.bf16 %v254_v52, %v248_v49  ;;  %v260_v3 = vmul.f32 0.25, %v254_v52  ;;  %v315_v52 = vld [vmem:[#allocation7 + $0x30] sm:$0xff] }
 0x1bb   :  { %v1132_v55 = vpack.c.bf16 %v256_v53, %v250_v50  ;;  %v1564_v56 = vpack.i.bf16 %v256_v53, %v250_v50  ;;  %v316_v53 = vld [vmem:[#allocation7 + $0x38] sm:$0xff] }
 0x1bc   :  { %1224 = vrot.lane.b32.xlu1 %v1223_v54, %s1452_s2  ;;  %1219 = vrot.lane.b32.xlu0 %v1223_v54, %s1453_s21 }
 0x1bd   :  { %1133 = vmatprep.subr.bf16.mxu0 %v1132_v55 }
 0x1be   :  { %1135 = vmatpush3.bf16.msra.mxu0 %v1132_v55 }
 0x1c0   :  { %1229 = vrot.lane.b32.xlu1 %v1223_v54, %s1454_s22 }
 0x1c4   :  { %1234 = vrot.lane.b32.xlu1 %v1223_v54, %s1455_s23 }
 0x22e   :  { %v1225_v57 = vpop.permute.xlu1 %1224  ;;  %v1220_v58 = vpop.permute.xlu0 %1219 }
 0x22f   :  { %1244 = vrot.lane.b32.xlu1 %v1225_v57, %s1455_s23  ;;  %1239 = vrot.lane.b32.xlu0 %v1220_v58, %s1455_s23 }
 0x232   :  { %v1230_v59 = vpop.permute.xlu1 %1229 }
 0x233   :  { %263 = vrot.lane.b32.xlu1 %v259_v51, %s1453_s21  ;;  %1249 = vrot.lane.b32.xlu0 %v1230_v59, %s1455_s23 }
 0x236   :  { %v1235_v60 = vpop.permute.xlu1 %1234 }
 0x237   :  { %v1237_v61 = vunpack.i.h.bf16 %v1235_v60  ;;  %v1236_v62 = vunpack.i.l.bf16 %v1235_v60  ;;  %267 = vrot.lane.b32.xlu1 %v259_v51, %s1452_s2  ;;  %265 = vrot.lane.b32.xlu0 %v260_v3, %s1453_s21 }
 0x239   :  { %v1108_v2 = vpack.c.bf16 %v1237_v61, %v1236_v62 }
 0x23b   :  { %1110 = vmatprep.subr.msk.bf16.mxu1 %vm1570_vm2, %v1108_v2  ;;  %271 = vrot.lane.b32.xlu1 %v259_v51, %s1454_s22 }
 0x23c   :  { %1113 = vmatpush3.bf16.xpose.msk.msra.mxu1 %vm1570_vm2, %v1108_v2  ;;  %269 = vrot.lane.b32.xlu0 %v260_v3, %s1452_s2 }
 0x23f   :  { %1254 = vrot.lane.b32.xlu1 %v1564_v56, %s1453_s21 }
 0x240   :  { %273 = vrot.lane.b32.xlu0 %v260_v3, %s1454_s22 }
 0x2a1   :  { %v1245_v4 = vpop.permute.xlu1 %1244  ;;  %v1240_v5 = vpop.permute.xlu0 %1239 }
 0x2a2   :  { %v1247_v6 = vunpack.i.h.bf16 %v1245_v4  ;;  %v1246_v7 = vunpack.i.l.bf16 %v1245_v4  ;;  %v1242_v8 = vunpack.i.h.bf16 %v1240_v5  ;;  %v1241_v9 = vunpack.i.l.bf16 %v1240_v5 }
 0x2a4   :  { %v1114_v10 = vpack.c.bf16 %v1242_v8, %v1241_v9  ;;  %v1120_v12 = vpack.c.bf16 %v1247_v6, %v1246_v7 }
 0x2a5   :  { %v264_v11 = vpop.permute.xlu1 %263  ;;  %v1250_v14 = vpop.permute.xlu0 %1249 }
 0x2a6   :  { %1116 = vmatprep.subr.msk.bf16.mxu1 %vm1570_vm2, %v1114_v10  ;;  %v1252_v16 = vunpack.i.h.bf16 %v1250_v14  ;;  %v1251_v17 = vunpack.i.l.bf16 %v1250_v14 }
 0x2a7   :  { %1119 = vmatpush3.bf16.xpose.msk.msra.mxu1 %vm1570_vm2, %v1114_v10 }
 0x2a8   :  { %1122 = vmatprep.subr.msk.bf16.mxu1 %vm1570_vm2, %v1120_v12  ;;  %v1126_v19 = vpack.c.bf16 %v1252_v16, %v1251_v17 }
 0x2a9   :  { %v268_v15 = vpop.permute.xlu1 %267  ;;  %v266_v24 = vpop.permute.xlu0 %265 }
 0x2ad   :  { %v272_v18 = vpop.permute.xlu1 %271 }
 0x2ae   :  { %v270_v25 = vpop.permute.xlu0 %269 }
 0x2af   :  { %1125 = vmatpush3.bf16.xpose.msk.msra.mxu1 %vm1570_vm2, %v1120_v12 }
 0x2b0   :  { %1128 = vmatprep.subr.msk.bf16.mxu1 %vm1570_vm2, %v1126_v19 }
 0x2b1   :  { %v1255_v20 = vpop.permute.xlu1 %1254 }
 0x2b2   :  { %v1257_v21 = vunpack.i.h.bf16 %v1255_v20  ;;  %v1256_v22 = vunpack.i.l.bf16 %v1255_v20  ;;  %v274_v26 = vpop.permute.xlu0 %273 }
 0x2b4   :  { %v1136_v23 = vpack.c.bf16 %v1257_v21, %v1256_v22 }
 0x2b6   :  { %1137 = vmatprep.subr.bf16.mxu0 %v1136_v23 }
 0x2b7   :  { %1131 = vmatpush3.bf16.xpose.msk.msra.mxu1 %vm1570_vm2, %v1126_v19  ;;  %1139 = vmatpush3.bf16.msra.mxu0 %v1136_v23 }
 0x2be   :  { %1053 = vmatmul.mubr.msk.f32.vlgmr.msra.gmra.mrb[0].mxu1 %vm333_vm1, %v260_v3 }
 0x2bf   :  { %1055 = vmatprep.mubr.msk.f32.mxu1 %vm333_vm1, %v264_v11 }
 0x2c2   :  { %1056 = vmatmul.mubr.msk.f32.gmra.mrb[2].mxu1 %vm333_vm1, %v266_v24 }
 0x2c3   :  { %1058 = vmatprep.mubr.msk.f32.mxu1 %vm333_vm1, %v268_v15 }
 0x2c6   :  { %1059 = vmatmul.mubr.msk.f32.gmra.mrb[4].mxu1 %vm333_vm1, %v270_v25 }
 0x2c7   :  { %1061 = vmatprep.mubr.msk.f32.mxu1 %vm333_vm1, %v272_v18 }
 0x2ca   :  { %1062 = vmatmul.mubr.msk.f32.gmra.mrb[6].mxu1 %vm333_vm1, %v274_v26 }
 0x391   :  { %v1054_v29 = vpop.f32.mrb[0].mxu1 }
 0x392   :  { %v1602_v30 = vadd.f32 %v1054_v29, %v310_v27  ;;  %v432_v31 = vpop.f32.mrb[1].mxu1 }
 0x393   :  { %v433_v35 = vadd.f32 %v432_v31, %v309_v28 }
 0x394   :  { %v474_v37 = vsel %vm133_vm0, %v1602_v30, -inf }
 0x395   :  { %475 = vmax.xlane.f32.xlu0 %v474_v37  ;;  %v1057_v38 = vpop.f32.mrb[2].mxu1  ;;  %v471_v40 = vsel %vm133_vm0, %v433_v35, -inf }
 0x396   :  { %v448_v41 = vadd.f32 %v1057_v38, %v312_v36  ;;  %v442_v42 = vpop.f32.mrb[3].mxu1  ;;  %472 = vmax.xlane.f32.xlu1 %v471_v40 }
 0x397   :  { %v443_v43 = vadd.f32 %v442_v42, %v311_v39 }
 0x398   :  { %v480_v44 = vsel %vm133_vm0, %v448_v41, -inf }
 0x399   :  { %481 = vmax.xlane.f32.xlu0 %v480_v44  ;;  %v1060_v47 = vpop.f32.mrb[4].mxu1  ;;  %v477_v51 = vsel %vm133_vm0, %v443_v43, -inf }
 0x39a   :  { %v452_v48 = vpop.f32.mrb[5].mxu1  ;;  %v458_v50 = vadd.f32 %v1060_v47, %v314_v46 }
 0x39b   :  { %v453_v49 = vadd.f32 %v452_v48, %v313_v45 }
 0x39c   :  { %v486_v60 = vsel %vm133_vm0, %v458_v50, -inf }
 0x39d   :  { %v1063_v54 = vpop.f32.mrb[6].mxu1  ;;  %478 = vmax.xlane.f32.xlu0 %v477_v51  ;;  %v483_v55 = vsel %vm133_vm0, %v453_v49, -inf }
 0x39e   :  { %v462_v57 = vpop.f32.mrb[7].mxu1  ;;  %484 = vmax.xlane.f32.xlu1 %v483_v55  ;;  %v468_v59 = vadd.f32 %v1063_v54, %v316_v53 }
 0x39f   :  { %v463_v58 = vadd.f32 %v462_v57, %v315_v52 }
 0x3a0   :  { %v492_v62 = vsel %vm133_vm0, %v468_v59, -inf }
 0x3a1   :  { %487 = vmax.xlane.f32.xlu0 %v486_v60  ;;  %v489_v61 = vsel %vm133_vm0, %v463_v58, -inf }
 0x3a2   :  { %490 = vmax.xlane.f32.xlu1 %v489_v61 }
 0x3a5   :  { %493 = vmax.xlane.f32.xlu0 %v492_v62 }
 0x3b3   :  { %1264 = vrot.lane.b32.xlu1 %v1564_v56, %s1454_s22 }
 0x3bb   :  { %1259 = vrot.lane.b32.xlu0 %v1564_v56, %s1452_s2 }
 0x422   :  { %v476_v63 = vpop.xlane.xlu0 %475 }
 0x423   :  { %v473_v2 = vpop.xlane.xlu1 %472  ;;  %v496_v56 = vsub.f32 %v1602_v30, %v476_v63 }
 0x424   :  { %v495_v3 = vsub.f32 %v433_v35, %v473_v2 }
 0x425   :  { %v505_v25 = vmul.f32 1.442695, %v496_v56 }
 0x426   :  { %v503_v4 = vmul.f32 1.442695, %v495_v3  ;;  %v482_v5 = vpop.xlane.xlu0 %481 }
 0x427   :  { %v498_v6 = vsub.f32 %v448_v41, %v482_v5 }
 0x428   :  { %1308 = vpow2.f32 %v503_v4 }
 0x429   :  { %v509_v11 = vmul.f32 1.442695, %v498_v6 }
 0x42a   :  { %v479_v7 = vpop.xlane.xlu0 %478 }
 0x42b   :  { %v497_v8 = vsub.f32 %v443_v43, %v479_v7  ;;  %v485_v9 = vpop.xlane.xlu1 %484 }
 0x42c   :  { %v499_v10 = vsub.f32 %v453_v49, %v485_v9 }
 0x42d   :  { %v507_v12 = vmul.f32 1.442695, %v497_v8 }
 0x42e   :  { %v511_v14 = vmul.f32 1.442695, %v499_v10  ;;  %v488_v15 = vpop.xlane.xlu0 %487 }
 0x42f   :  { %1310 = vpow2.f32 %v507_v12  ;;  %v500_v16 = vsub.f32 %v458_v50, %v488_v15  ;;  %v491_v17 = vpop.xlane.xlu1 %490 }
 0x430   :  { %1312 = vpow2.f32 %v511_v14  ;;  %v501_v18 = vsub.f32 %v463_v58, %v491_v17 }
 0x431   :  { %1314 = vpow2.f32 %v509_v11  ;;  %v513_v20 = vmul.f32 1.442695, %v500_v16 }
 0x432   :  { %v1309_v19 = vpop.eup %1308  ;;  %v515_v21 = vmul.f32 1.442695, %v501_v18  ;;  %v494_v22 = vpop.xlane.xlu0 %493 }
 0x433   :  { %v502_v23 = vsub.f32 %v468_v59, %v494_v22  ;;  %1080 = vmatprep.mubr.msk.f32.mxu0 %vm133_vm0, %v1309_v19  ;;  %v1265_v24 = vpop.permute.xlu1 %1264  ;;  %v519_v51 = vsel %vm133_vm0, %v1309_v19, 0.0 }
 0x434   :  { %1316 = vpow2.f32 %v515_v21  ;;  %v1267_v27 = vunpack.i.h.bf16 %v1265_v24  ;;  %v1266_v29 = vunpack.i.l.bf16 %v1265_v24 }
 0x435   :  { %v517_v26 = vmul.f32 1.442695, %v502_v23  ;;  %1318 = vpow2.f32 %v513_v20 }
 0x436   :  { %v1260_v28 = vpop.permute.xlu0 %1259  ;;  %v1144_v40 = vpack.c.bf16 %v1267_v27, %v1266_v29 }
 0x437   :  { %1320 = vpow2.f32 %v517_v26  ;;  %v1262_v30 = vunpack.i.h.bf16 %v1260_v28  ;;  %v1261_v31 = vunpack.i.l.bf16 %v1260_v28 }
 0x438   :  { %1322 = vpow2.f32 %v505_v25 }
 0x439   :  { %v1311_v35 = vpop.eup %1310  ;;  %v1140_v36 = vpack.c.bf16 %v1262_v30, %v1261_v31 }
 0x43a   :  { %v1313_v37 = vpop.eup %1312  ;;  %v525_v38 = vsel %vm133_vm0, %v1311_v35, 0.0 }
 0x43b   :  { %v1315_v39 = vpop.eup %1314  ;;  %526 = vadd.xlane.f32.xlu1 %v525_v38  ;;  %1141 = vmatprep.subr.bf16.mxu0 %v1140_v36  ;;  %v531_v41 = vsel %vm133_vm0, %v1313_v37, 0.0 }
 0x43c   :  { %532 = vadd.xlane.f32.xlu0 %v531_v41  ;;  %1143 = vmatpush3.bf16.msra.mxu0 %v1140_v36  ;;  %v528_v43 = vsel %vm133_vm0, %v1315_v39, 0.0 }
 0x43d   :  { %1145 = vmatprep.subr.bf16.mxu0 %v1144_v40 }
 0x43e   :  { %v1317_v42 = vpop.eup %1316 }
 0x43f   :  { %529 = vadd.xlane.f32.xlu1 %v528_v43  ;;  %v537_v44 = vsel %vm133_vm0, %v1317_v42, 0.0  ;;  %v1319_v45 = vpop.eup %1318 }
 0x440   :  { %538 = vadd.xlane.f32.xlu0 %v537_v44  ;;  %1147 = vmatpush3.bf16.msra.mxu0 %v1144_v40  ;;  %v534_v49 = vsel %vm133_vm0, %v1319_v45, 0.0 }
 0x441   :  { %v1321_v46 = vpop.eup %1320 }
 0x442   :  { %v1323_v47 = vpop.eup %1322  ;;  %v540_v48 = vsel %vm133_vm0, %v1321_v46, 0.0 }
 0x443   :  { %541 = vadd.xlane.f32.xlu1 %v540_v48  ;;  %1081 = vmatmul.mubr.msk.f32.vlgmr.msra.gmra.mrb[4].mxu0 %vm133_vm0, %v1323_v47  ;;  %v522_v50 = vsel %vm133_vm0, %v1323_v47, 0.0  ;;  %v1283_v47 = vld [vmem:[#allocation5 + $0x14] ss:$8 sps:$4 sm:$0xff]   ;;  %v1285_v48 = vld [vmem:[#allocation5 + $0x10] ss:$8 sps:$4 sm:$0xff]  }
 0x444   :  { %535 = vadd.xlane.f32.xlu0 %v534_v49  ;;  %1083 = vmatprep.mubr.msk.f32.mxu0 %vm133_vm0, %v1311_v35  ;;  %v1286_v49 = vld [vmem:[#allocation5 + $0x24] ss:$8 sps:$4 sm:$0xff]  }
 0x447   :  { %523 = vadd.xlane.f32.xlu1 %v522_v50  ;;  %1084 = vmatmul.mubr.msk.f32.gmra.mrb[6].mxu0 %vm133_vm0, %v1315_v39  ;;  %v1289_v50 = vld [vmem:[#allocation5 + $0x34] ss:$8 sps:$4 sm:$0xff]  }
 0x448   :  { %520 = vadd.xlane.f32.xlu0 %v519_v51  ;;  %1086 = vmatprep.mubr.msk.f32.mxu0 %vm133_vm0, %v1313_v37  ;;  %v1291_v51 = vld [vmem:[#allocation5 + $0x30] ss:$8 sps:$4 sm:$0xff]  }
 0x44b   :  { %1087 = vmatmul.mubr.msk.f32.gmra.mrb[8].mxu0 %vm133_vm0, %v1319_v45  ;;  %v1280_v45 = vld [vmem:[#allocation5 + $0x4] ss:$8 sps:$4 sm:$0xff]  }
 0x44c   :  { %1089 = vmatprep.mubr.msk.f32.mxu0 %vm133_vm0, %v1317_v42  ;;  %1149 = vmatprep.subr.bf16.mxu0 %v1280_v45 }
 0x44f   :  { %1090 = vmatmul.mubr.msk.f32.gmra.mrb[10].mxu0 %vm133_vm0, %v1321_v46  ;;  %v1282_v46 = vld [vmem:[#allocation5] ss:$8 sps:$4 sm:$0xff]  }
 0x450   :  { %842 = vmatprep.mubr.f32.mxu0 %v1451_v13  ;;  %1151 = vmatpush1.bf16.msra.mxu0 %v1282_v46 }
 0x451   :  { %1153 = vmatprep.subr.bf16.mxu0 %v1283_v47 }
 0x454   :  { %1155 = vmatpush1.bf16.msra.mxu0 %v1285_v48 }
 0x455   :  { %1157 = vmatprep.subr.bf16.mxu0 %v1286_v49 }
 0x4c8   :  { %v527_v53 = vpop.xlane.xlu1 %526 }
 0x4c9   :  { %v533_v52 = vpop.xlane.xlu0 %532 }
 0x4cc   :  { %v530_v55 = vpop.xlane.xlu1 %529 }
 0x4cd   :  { %v539_v54 = vpop.xlane.xlu0 %538  ;;  %1324 = vrcp.f32 %v530_v55  ;;  %v1297_v55 = vld [vmem:[#allocation5 + $0x50] ss:$8 sps:$4 sm:$0xff]  }
 0x4ce   :  { %1326 = vrcp.f32 %v527_v53  ;;  %v1294_v53 = vld [vmem:[#allocation5 + $0x40] ss:$8 sps:$4 sm:$0xff]  }
 0x4d0   :  { %v542_v61 = vpop.xlane.xlu1 %541 }
 0x4d1   :  { %v536_v57 = vpop.xlane.xlu0 %535 }
 0x4d2   :  { %1328 = vrcp.f32 %v536_v57 }
 0x4d3   :  { %1330 = vrcp.f32 %v533_v52  ;;  %v1292_v52 = vld [vmem:[#allocation5 + $0x44] ss:$8 sps:$4 sm:$0xff]  }
 0x4d4   :  { %1332 = vrcp.f32 %v539_v54  ;;  %v524_v18 = vpop.xlane.xlu1 %523  ;;  %v1295_v54 = vld [vmem:[#allocation5 + $0x54] ss:$8 sps:$4 sm:$0xff]   ;;  %1165 = vmatprep.subr.bf16.mxu1 %v1292_v52 }
 0x4d5   :  { %1334 = vrcp.f32 %v542_v61  ;;  %v521_v56 = vpop.xlane.xlu0 %520  ;;  %1167 = vmatpush1.bf16.xpose.msra.mxu1 %v1294_v53 }
 0x4d6   :  { %1336 = vrcp.f32 %v521_v56  ;;  %1169 = vmatprep.subr.bf16.mxu1 %v1295_v54 }
 0x4d7   :  { %v1325_v60 = vpop.eup %1324  ;;  %1338 = vrcp.f32 %v524_v18 }
 0x4d8   :  { %v1327_v63 = vpop.eup %1326 }
 0x4dc   :  { %v1329_v5 = vpop.eup %1328 }
 0x4dd   :  { %v1331_v7 = vpop.eup %1330  ;;  %1171 = vmatpush1.bf16.xpose.msra.mxu1 %v1297_v55 }
 0x4de   :  { %v1333_v12 = vpop.eup %1332 }
 0x4df   :  { %v1335_v16 = vpop.eup %1334 }
 0x4e0   :  { %v1337_v21 = vpop.eup %1336 }
 0x4e1   :  { %v1339_v25 = vpop.eup %1338 }
 0x516   :  { %v1082_v58 = vpop.f32.mrb[4].mxu0 }
 0x517   :  { %v633_v59 = vpop.f32.mrb[5].mxu0  ;;  %v681_v28 = vmul.f32 %v1339_v25, %v1082_v58  ;;  %v1301_v25 = vld [vmem:[#allocation5 + $0x74] ss:$8 sps:$4 sm:$0xff]  }
 0x518   :  { %v680_v23 = vmul.f32 %v1337_v21, %v633_v59 }
 0x51a   :  { %v1085_v62 = vpop.f32.mrb[6].mxu0 }
 0x51b   :  { %v683_v2 = vmul.f32 %v1325_v60, %v1085_v62  ;;  %v643_v3 = vpop.f32.mrb[7].mxu0 }
 0x51c   :  { %v682_v4 = vmul.f32 %v1327_v63, %v643_v3 }
 0x51d   :  { %692 = vrot.lane.b32.xlu1 %v683_v2, %s1456_s26 }
 0x51e   :  { %690 = vrot.lane.b32.xlu0 %v682_v4, %s1456_s26  ;;  %v1088_v6 = vpop.f32.mrb[8].mxu0 }
 0x51f   :  { %v685_v8 = vmul.f32 %v1329_v5, %v1088_v6  ;;  %v653_v9 = vpop.f32.mrb[9].mxu0 }
 0x520   :  { %v684_v10 = vmul.f32 %v1331_v7, %v653_v9  ;;  %v754_v9 = vsub.s32 2, %v1547_v32 }
 0x522   :  { %700 = vrot.lane.b32.xlu0 %v685_v8, %s1457_s27  ;;  %698 = vrot.lane.b32.xlu1 %v684_v10, %s1457_s27  ;;  %v1091_v11 = vpop.f32.mrb[10].mxu0  ;;  %v760_v10 = vsub.s32 3, %v1547_v32 }
 0x523   :  { %v663_v14 = vpop.f32.mrb[11].mxu0  ;;  %v687_v17 = vmul.f32 %v1335_v16, %v1091_v11 }
 0x524   :  { %v686_v15 = vmul.f32 %v1333_v12, %v663_v14  ;;  %v755_v12 = vrot.slane %v1552_v34, %v754_v9  ;;  %v761_v16 = vrot.slane %v1552_v34, %v760_v10 }
 0x526   :  { %706 = vrot.lane.b32.xlu1 %v686_v15, %s1458_s28 }
 0x52a   :  { %708 = vrot.lane.b32.xlu1 %v687_v17, %s1458_s28 }
 0x58f   :  { %v693_v19 = vpop.permute.xlu1 %692 }
 0x590   :  { %v691_v20 = vpop.permute.xlu0 %690  ;;  %v713_v35 = vsel %vm333_vm1, %v681_v28, %v693_v19  ;;  %v132_v28 = vunpack.c.h.bf16 %v1549_v33 }
 0x591   :  { %v712_v24 = vsel %vm333_vm1, %v680_v23, %v691_v20  ;;  %v1298_v23 = vld [vmem:[#allocation5 + $0x64] ss:$8 sps:$4 sm:$0xff]  }
 0x592   :  { %1173 = vmatprep.subr.bf16.mxu1 %v1298_v23 }
 0x594   :  { %v699_v22 = vpop.permute.xlu1 %698  ;;  %v701_v29 = vpop.permute.xlu0 %700 }
 0x595   :  { %v715_v26 = vsel %vm714_vm3, %v712_v24, %v699_v22  ;;  %v716_v36 = vsel %vm714_vm3, %v713_v35, %v701_v29  ;;  %v1300_v24 = vld [vmem:[#allocation5 + $0x60] ss:$8 sps:$4 sm:$0xff]  }
 0x596   :  { %1175 = vmatpush1.bf16.xpose.msra.mxu1 %v1300_v24 }
 0x597   :  { %1177 = vmatprep.subr.bf16.mxu1 %v1301_v25 }
 0x598   :  { %v707_v27 = vpop.permute.xlu1 %706 }
 0x599   :  { %v718_v30 = vsel %vm717_vm4, %v715_v26, %v707_v27  ;;  %v1303_v26 = vld [vmem:[#allocation5 + $0x70] ss:$8 sps:$4 sm:$0xff]   ;;  %v766_v27 = vsub.s32 5, %v1547_v32 }
 0x59a   :  { %v720_v31 = vadd.f32 %v718_v30, %v1534_v1 }
 0x59b   :  { %v767_v29 = vrot.slane %v1552_v34, %v766_v27  ;;  %v771_v30 = vrot.slane %v132_v28, %v766_v27 }
 0x59c   :  { %v709_v37 = vpop.permute.xlu1 %708  ;;  %v722_v38 = vsel %vm133_vm0, %v720_v31, 0.0  ;;  %v728_v39 = vmul.f32 %v720_v31, %v720_v31 }
 0x59d   :  { %v719_v40 = vsel %vm717_vm4, %v716_v36, %v709_v37  ;;  %723 = vadd.xlane.f32.xlu0 %v722_v38 }
 0x59e   :  { %v721_v41 = vadd.f32 %v719_v40, %v1532_v0  ;;  %v730_v42 = vsel %vm133_vm0, %v728_v39, 0.0  ;;  %v1288_v0 = vld [vmem:[#allocation5 + $0x20] ss:$8 sps:$4 sm:$0xff]   ;;  %1179 = vmatpush1.bf16.xpose.msra.mxu1 %v1303_v26 }
 0x59f   :  { %731 = vadd.xlane.f32.xlu1 %v730_v42  ;;  %1159 = vmatpush1.bf16.msra.mxu0 %v1288_v0 }
 0x5a0   :  { %v725_v43 = vsel %vm133_vm0, %v721_v41, 0.0  ;;  %v729_v44 = vmul.f32 %v721_v41, %v721_v41  ;;  %1161 = vmatprep.subr.bf16.mxu0 %v1289_v50 }
 0x5a1   :  { %726 = vadd.xlane.f32.xlu0 %v725_v43 }
 0x5a2   :  { %v733_v1 = vsel %vm133_vm0, %v729_v44, 0.0 }
 0x5a3   :  { %1163 = vmatpush1.bf16.msra.mxu0 %v1291_v51 }
 0x5a5   :  { %734 = vadd.xlane.f32.xlu0 %v733_v1 }
 0x62a   :  { %v724_v57 = vpop.xlane.xlu0 %723 }
 0x62b   :  { %v736_v58 = vmul.f32 0.015625, %v724_v57 }
 0x62c   :  { %v732_v59 = vpop.xlane.xlu1 %731 }
 0x62d   :  { %v740_v60 = vmul.f32 %v736_v58, %v736_v58  ;;  %v738_v61 = vmul.f32 0.015625, %v732_v59  ;;  %v744_v11 = vsub.f32 %v720_v31, %v736_v58  ;;  %v877_v59 = vsub.s32 4, %v1547_v32 }
 0x62e   :  { %v727_v62 = vpop.xlane.xlu0 %726 }
 0x62f   :  { %v742_v63 = vsub.f32 %v738_v61, %v740_v60  ;;  %v737_v2 = vmul.f32 0.015625, %v727_v62  ;;  %v878_v60 = vrot.slane %v1552_v34, %v877_v59 }
 0x631   :  { %v746_v3 = vadd.f32 1e-05, %v742_v63  ;;  %v741_v5 = vmul.f32 %v737_v2, %v737_v2  ;;  %v745_v56 = vsub.f32 %v721_v41, %v737_v2 }
 0x632   :  { %v735_v4 = vpop.xlane.xlu0 %734 }
 0x633   :  { %1340 = vrsqrt.f32 %v746_v3  ;;  %v739_v6 = vmul.f32 0.015625, %v735_v4 }
 0x635   :  { %v743_v7 = vsub.f32 %v739_v6, %v741_v5 }
 0x637   :  { %v747_v8 = vadd.f32 1e-05, %v743_v7 }
 0x639   :  { %1342 = vrsqrt.f32 %v747_v8 }
 0x63d   :  { %v1341_v14 = vpop.eup %1340 }
 0x63e   :  { %v750_v15 = vmul.f32 %v1341_v14, %v744_v11 }
 0x640   :  { %v756_v17 = vmul.f32 %v755_v12, %v750_v15 }
 0x642   :  { %v762_v18 = vadd.f32 %v761_v16, %v756_v17 }
 0x643   :  { %v1343_v19 = vpop.eup %1342 }
 0x644   :  { %1002 = vmatmul.mubr.msk.f32.vlgmr.msra.gmra.mrb[12].mxu0 %vm133_vm0, %v762_v18  ;;  %v751_v20 = vmul.f32 %v1343_v19, %v745_v56 }
 0x645   :  { %848 = vmatprep.mubr.f32.mxu0 %v1451_v13 }
 0x646   :  { %v757_v21 = vmul.f32 %v755_v12, %v751_v20 }
 0x648   :  { %v763_v22 = vadd.f32 %v761_v16, %v757_v21 }
 0x64a   :  { %1003 = vmatmul.mubr.msk.f32.gmra.mrb[14].mxu0 %vm133_vm0, %v763_v22 }
 0x717   :  { %v844_v13 = vpop.f32.mrb[12].mxu0 }
 0x718   :  { %v845_v31 = vadd.f32 %v844_v13, %v767_v29  ;;  %v846_v35 = vpop.f32.mrb[13].mxu0 }
 0x719   :  { %v847_v36 = vadd.f32 %v846_v35, %v771_v30 }
 0x71a   :  { %v859_v37 = vmul.f32 0.70710677, %v845_v31  ;;  %v855_v48 = vmul.f32 0.5, %v845_v31 }
 0x71b   :  { %v860_v38 = vmul.f32 0.70710677, %v847_v36  ;;  %v856_v46 = vmul.f32 0.5, %v847_v36 }
 0x71c   :  { %1344 = verf.f32 %v859_v37 }
 0x71d   :  { %1346 = verf.f32 %v860_v38  ;;  %v850_v39 = vpop.f32.mrb[14].mxu0 }
 0x71e   :  { %v851_v40 = vadd.f32 %v850_v39, %v767_v29  ;;  %v852_v41 = vpop.f32.mrb[15].mxu0 }
 0x71f   :  { %v853_v42 = vadd.f32 %v852_v41, %v771_v30 }
 0x720   :  { %v861_v43 = vmul.f32 0.70710677, %v851_v40  ;;  %v857_v55 = vmul.f32 0.5, %v851_v40 }
 0x721   :  { %v862_v44 = vmul.f32 0.70710677, %v853_v42  ;;  %v858_v53 = vmul.f32 0.5, %v853_v42 }
 0x722   :  { %1348 = verf.f32 %v861_v43 }
 0x723   :  { %1350 = verf.f32 %v862_v44 }
 0x726   :  { %v1345_v33 = vpop.eup %1344 }
 0x727   :  { %v1347_v1 = vpop.eup %1346  ;;  %v867_v45 = vadd.f32 1.0, %v1345_v33 }
 0x728   :  { %v868_v47 = vadd.f32 1.0, %v1347_v1 }
 0x729   :  { %v871_v0 = vmul.f32 %v867_v45, %v855_v48 }
 0x72a   :  { %v872_v49 = vmul.f32 %v868_v47, %v856_v46 }
 0x72c   :  { %v1349_v50 = vpop.eup %1348  ;;  %943 = vmatprep.mubr.f32.mxu1 %v872_v49 }
 0x72d   :  { %v1351_v51 = vpop.eup %1350  ;;  %v869_v52 = vadd.f32 1.0, %v1349_v50  ;;  %944 = vmatmul.mubr.f32.vlgmr.msra.gmra.mrb[8].mxu1 %v871_v0 }
 0x72e   :  { %v870_v54 = vadd.f32 1.0, %v1351_v51 }
 0x72f   :  { %v873_v58 = vmul.f32 %v869_v52, %v857_v55 }
 0x730   :  { %v874_v57 = vmul.f32 %v870_v54, %v858_v53 }
 0x732   :  { %948 = vmatprep.mubr.f32.mxu1 %v874_v57 }
 0x733   :  { %949 = vmatmul.mubr.f32.gmra.mrb[10].mxu1 %v873_v58 }
 0x800   :  { %v945_v61 = vpop.f32.mrb[8].mxu1 }
 0x801   :  { %v946_v62 = vadd.f32 %v945_v61, %v878_v60  ;;  %v947_v63 = vpop.f32.mrb[9].mxu1 }
 0x803   :  { %v954_v2 = vadd.f32 %v946_v62, %v762_v18 }
 0x805   :  { %956 = vst.msk [vmem:[#allocation8] sm:$0xff] %vm133_vm0, %v954_v2 }
 0x806   :  { %v950_v3 = vpop.f32.mrb[10].mxu1 }
 0x807   :  { %v951_v4 = vadd.f32 %v950_v3, %v878_v60  ;;  %v952_v5 = vpop.f32.mrb[11].mxu1 }
 0x809   :  { %v955_v6 = vadd.f32 %v951_v4, %v763_v22 }
 0x80b   :  { %957 = vst.msk [vmem:[#allocation8 + $0x8] sm:$0xff] %vm133_vm0, %v955_v6 }
 0x80c   :  { %1429 = shalt.err (!%p1426_p0)
}
 0x80d   :  { %s1430_s7 = scalar_lea.hbm %s1675_s3, 256 }
 0x80e   :  { %p1431_p1 = scmp.ne.s32.totalorder %s1675_s3, %s1430_s7  ;;  %p1434_p2 = scmp.lt.u32.totalorder %s1430_s7, %s1675_s3 }
 0x810   :  { %p1436_p3 = pnand %p1434_p2, %p1431_p1 }
 0x812   :  { %1439 = shalt.err (!%p1436_p3)
}
 0x813   :  { %969 = dma.vmem_to_hbm [thread:$0]  %s964_s30, 256, %s1675_s3, [#allocation4], %s1448_s24, %s1448_s24, %s1449_s25  }
 0x814   :  { %1444 = dma.done.wait [#allocation4], 256  }
 0x815   :  { %1445 = vsyncadd [#allocation4], 4294967040 }
 0x816   :  { %973 = vsyncpa [#allocation3], 1 }
 0x817   :  { %974 = vsyncpa [#allocation6], 1 }
 0x818   :  { %975 = vsyncpa [#allocation4], 1 }

</bundles_post_ra>
